<compile_context>
chip_gen: v7x
topology: tpu7x:2x2x1
jax: 0.10.0
libtpu: 0.0.40
codegen_flags: <defaults>
</compile_context>

<pallas_src>
import jax
import jax.numpy as jnp
import numpy as np
from jax.experimental import pallas as pl
from jax.experimental.pallas import tpu as pltpu

EPS = 1e-5
HIDDEN = 64        # fixed by the module: nn.Linear(ROInum, 64)
NUM_CLASS = 2
OUT_LANES = 128    # lane-dense output slab; real classes live in [:, :C]


# --------------------------------------------------------------------------
# Fused kernel: GCN -> BN1 -> ReLU -> Linear -> BN2 -> ReLU -> Linear -> Softmax
# --------------------------------------------------------------------------
def _fused_kernel(g_ref, w_ref, pr_ref, w1_ref, p64_ref, w2_ref, b2_ref, o_ref):
    g = g_ref[...].astype(jnp.float32)             # (tb, R, R) adjacency tile
    w = w_ref[...]                                 # (1, R) GCN projection weight
    pr = pr_ref[...]                               # (3, R): [gcn bias row, bn1 scale, bn1 shift]
    p64 = p64_ref[...]                             # (3, H): [fl1 bias, bn2 scale, bn2 shift]

    # GCN with identity node features: relu(A @ w + b).
    # Kept on VPU mul + lane reduce (see header: MXU matvec would need an XLU
    # relayout of the result of the same cost class).
    y = jnp.sum(g * w[0], axis=2)                  # (tb, R) == A @ w
    y = jnp.maximum(y + pr[0], 0.0)

    # BatchNorm1d(R) (folded scale/shift) + ReLU
    z = jnp.maximum(y * pr[1] + pr[2], 0.0)

    # Linear(R, 64) on the MXU, then BatchNorm1d(64) + ReLU
    h = jnp.dot(z, w1_ref[...], preferred_element_type=jnp.float32) + p64[0]
    h = jnp.maximum(h * p64[1] + p64[2], 0.0)

    # Linear(64, 128-lane-padded C) + Softmax(dim=1).  Padded columns carry a
    # large negative bias -> exp()==0, so softmax over all 128 lanes equals
    # softmax over the real classes; the store is a full-lane unmasked vst.
    logits = jnp.dot(h, w2_ref[...], preferred_element_type=jnp.float32) + b2_ref[...]
    m = jnp.max(logits, axis=1, keepdims=True)
    e = jnp.exp(logits - m)
    inv = pl.reciprocal(jnp.sum(e, axis=1, keepdims=True), approx=True)
    o_ref[...] = (e * inv).astype(o_ref.dtype)


# --------------------------------------------------------------------------
# Generation-aware VMEM budget and batch-tile selection.
# --------------------------------------------------------------------------
def _vmem_budget():
    try:
        phys = pltpu.get_tpu_info().vmem_capacity_bytes
    except Exception:                              # pragma: no cover - defensive
        phys = 64 * 1024 * 1024                    # conservative (v7x-sized) fallback
    vmem_limit = (phys * 7) // 8                   # 112 MiB on v5e/v6e, 56 MiB on v7x
    # 2 pipeline buffers + 1 in-kernel elementwise temporary share the budget;
    # 8 MiB reserved for output buffers / small operands / intermediates.
    adj_budget = (vmem_limit - 8 * 1024 * 1024) // 3
    return vmem_limit, max(adj_budget, 4 * 1024 * 1024)


def _choose_batch_tile(B, R, itemsize, adj_budget):
    # (8,128)-padded VMEM footprint of one adjacency sample (last dim -> lanes,
    # middle dim -> sublanes), not the raw HBM byte count.
    pad_r = ((R + 7) // 8) * 8
    pad_c = ((R + 127) // 128) * 128
    per_sample = pad_r * pad_c * itemsize
    tb = max(1, adj_budget // per_sample)
    tb = min(tb, B)
    # Keep >=2 grid steps (ideally 4-8+) so the batch axis can be sharded
    # across v7x's two TensorCores and the DMA pipeline stays full.
    if B >= 64:
        tb = min(tb, -(-B // 8))
    elif B >= 32:
        tb = min(tb, -(-B // 4))
    elif B >= 16:
        tb = min(tb, -(-B // 2))
    if tb < B:
        tb = max(8, (tb // 8) * 8)                 # sublane-aligned output blocks
    return min(tb, B)


# --------------------------------------------------------------------------
# Wrapper
# --------------------------------------------------------------------------
@jax.jit
def gcn_base_forward(g, params):
    B, R, _ = g.shape
    H = params["fl1_w"].shape[1]
    C = params["fl2_w"].shape[1]

    # Fold BN (eval-mode running stats) into scale/shift once, outside the kernel.
    def bn_fold(p):  # rows: gamma, beta, running_mean, running_var
        scale = p[0] * jax.lax.rsqrt(p[3] + EPS)
        return scale, p[1] - p[2] * scale

    s1, t1 = bn_fold(params["bn1_p"])
    s2, t2 = bn_fold(params["bn2_p"])
    pr = jnp.stack([jnp.full((R,), params["gcn_b"][0], jnp.float32), s1, t1])   # (3, R)
    p64 = jnp.stack([params["fl1_b"], s2, t2])                                  # (3, H)
    w_row = params["gcn_w"].reshape(1, R)

    # Lane-dense final projection: pad to 128 output lanes; padded columns get a
    # huge negative bias so they receive softmax weight 0.
    w2 = jnp.zeros((H, OUT_LANES), jnp.float32).at[:, :C].set(params["fl2_w"])
    b2 = jnp.full((1, OUT_LANES), -1e9, jnp.float32).at[0, :C].set(params["fl2_b"])

    vmem_limit, adj_budget = _vmem_budget()
    tb = _choose_batch_tile(B, R, g.dtype.itemsize, adj_budget)
    grid = (pl.cdiv(B, tb),)   # no jnp.pad: ragged last block handled by Pallas

    out = pl.pallas_call(
        _fused_kernel,
        out_shape=jax.ShapeDtypeStruct((B, OUT_LANES), jnp.float32),
        grid=grid,
        in_specs=[
            pl.BlockSpec((tb, R, R), lambda i: (i, 0, 0)),       # adjacency tile
            pl.BlockSpec((1, R), lambda i: (0, 0)),              # gcn weight
            pl.BlockSpec((3, R), lambda i: (0, 0)),              # gcn bias / bn1 scale / bn1 shift
            pl.BlockSpec((R, H), lambda i: (0, 0)),              # fl1 weight^T
            pl.BlockSpec((3, H), lambda i: (0, 0)),              # fl1 bias / bn2 scale / bn2 shift
            pl.BlockSpec((H, OUT_LANES), lambda i: (0, 0)),      # fl2 weight^T (lane-padded)
            pl.BlockSpec((1, OUT_LANES), lambda i: (0, 0)),      # fl2 bias (lane-padded)
        ],
        out_specs=pl.BlockSpec((tb, OUT_LANES), lambda i: (i, 0)),
        compiler_params=pltpu.CompilerParams(
            dimension_semantics=("parallel",),                   # batch tiles are independent
            vmem_limit_bytes=vmem_limit,
        ),
    )(g, w_row, pr, params["fl1_w"], p64, w2, b2)
    return out[:, :C]


# --------------------------------------------------------------------------
# Deterministic synthetic parameters (shapes taken from the module __init__).
# --------------------------------------------------------------------------
def init_params(key, roinum, num_class=NUM_CLASS, hidden=HIDDEN):
    ks = jax.random.split(key, 8)

    def nrm(k, shape, scale=0.1):
        return scale * jax.random.normal(k, shape, dtype=jnp.float32)

    def bn_pack(k, n):  # rows: gamma, beta, running_mean, running_var
        k1, k2, k3, k4 = jax.random.split(k, 4)
        gamma = 1.0 + 0.1 * jax.random.normal(k1, (n,))
        beta = 0.1 * jax.random.normal(k2, (n,))
        mean = 0.1 * jax.random.normal(k3, (n,))
        var = 0.5 + jax.random.uniform(k4, (n,))
        return jnp.stack([gamma, beta, mean, var]).astype(jnp.float32)

    return {
        "gcn_w": nrm(ks[0], (roinum,)),              # GCN proj Linear(ROI, 1).weight
        "gcn_b": nrm(ks[1], (1,)),
        "bn1_p": bn_pack(ks[2], roinum),
        "fl1_w": nrm(ks[3], (roinum, hidden)),       # Linear(ROI, 64).weight^T
        "fl1_b": nrm(ks[4], (hidden,)),
        "bn2_p": bn_pack(ks[5], hidden),
        "fl2_w": nrm(ks[6], (hidden, num_class)),    # Linear(64, C).weight^T
        "fl2_b": nrm(ks[7], (num_class,)),
    }


# --------------------------------------------------------------------------
# Pure-JAX reference (same math, no Pallas) for a correctness check.
# --------------------------------------------------------------------------
def reference_forward(g, p):
    def bn(v, pk):
        return (v - pk[2]) * (pk[0] / jnp.sqrt(pk[3] + EPS)) + pk[1]

    y = jax.nn.relu(jnp.einsum("brk,k->br", g, p["gcn_w"]) + p["gcn_b"][0])
    y = jax.nn.relu(bn(y, p["bn1_p"]))
    h = y @ p["fl1_w"] + p["fl1_b"]
    h = jax.nn.relu(bn(h, p["bn2_p"]))
    logits = h @ p["fl2_w"] + p["fl2_b"]
    return jax.nn.softmax(logits, axis=1)


if __name__ == "__main__":
    # TODO(synk): dropout(0.3) inside the GCN and BatchNorm batch statistics
    # are run in inference mode (dropout disabled, BN uses running statistics).
    B, R = 2, 16                      # batch, ROInum
    key = jax.random.PRNGKey(0)
    kx, kp = jax.random.split(key)
    g = jax.random.normal(kx, (B, R, R), dtype=jnp.float32)
    params = init_params(kp, R)

    out = gcn_base_forward(g, params)
    out = jax.block_until_ready(out)

    ref = reference_forward(g, params)
    assert out.shape == (B, NUM_CLASS)
    np.testing.assert_allclose(np.asarray(out), np.asarray(ref),
                               atol=2e-3, rtol=2e-3)
    print("KERNEL_OK")
</pallas_src>

<mosaic_0001>
module attributes {stable_mosaic.version = 11 : i64} {
  func.func @_fused_kernel(%arg0: i32, %arg1: memref<2x16x16xf32, #tpu.memory_space<vmem>>, %arg2: memref<1x16xf32, #tpu.memory_space<vmem>>, %arg3: memref<3x16xf32, #tpu.memory_space<vmem>>, %arg4: memref<16x64xf32, #tpu.memory_space<vmem>>, %arg5: memref<3x64xf32, #tpu.memory_space<vmem>>, %arg6: memref<64x128xf32, #tpu.memory_space<vmem>>, %arg7: memref<1x128xf32, #tpu.memory_space<vmem>>, %arg8: memref<2x128xf32, #tpu.memory_space<vmem>>) attributes {dimension_semantics = [#tpu.dimension_semantics<parallel>], iteration_bounds = array<i64: 1>, scalar_prefetch = 0 : i64, scratch_operands = 0 : i64, tpu.core_type = #tpu.core_type<tc>, window_params = [{transform_indices = @transform_0, window_bounds = array<i64: 2, 16, 16>}, {pipeline_mode = #tpu.pipeline_mode<synchronous>, transform_indices = @transform_1, window_bounds = array<i64: 1, 16>}, {pipeline_mode = #tpu.pipeline_mode<synchronous>, transform_indices = @transform_2, window_bounds = array<i64: 3, 16>}, {pipeline_mode = #tpu.pipeline_mode<synchronous>, transform_indices = @transform_3, window_bounds = array<i64: 16, 64>}, {pipeline_mode = #tpu.pipeline_mode<synchronous>, transform_indices = @transform_4, window_bounds = array<i64: 3, 64>}, {pipeline_mode = #tpu.pipeline_mode<synchronous>, transform_indices = @transform_5, window_bounds = array<i64: 64, 128>}, {pipeline_mode = #tpu.pipeline_mode<synchronous>, transform_indices = @transform_6, window_bounds = array<i64: 1, 128>}, {transform_indices = @transform_7, window_bounds = array<i64: 2, 128>}]} {
    %c0 = arith.constant 0 : index
    %c0_0 = arith.constant 0 : index
    %c0_1 = arith.constant 0 : index
    %0 = vector.load %arg1[%c0, %c0_0, %c0_1] : memref<2x16x16xf32, #tpu.memory_space<vmem>>, vector<2x16x16xf32>
    %c0_2 = arith.constant 0 : index
    %c0_3 = arith.constant 0 : index
    %1 = vector.load %arg2[%c0_2, %c0_3] : memref<1x16xf32, #tpu.memory_space<vmem>>, vector<1x16xf32>
    %c0_4 = arith.constant 0 : index
    %c0_5 = arith.constant 0 : index
    %2 = vector.load %arg3[%c0_4, %c0_5] : memref<3x16xf32, #tpu.memory_space<vmem>>, vector<3x16xf32>
    %c0_6 = arith.constant 0 : index
    %c0_7 = arith.constant 0 : index
    %3 = vector.load %arg5[%c0_6, %c0_7] : memref<3x64xf32, #tpu.memory_space<vmem>>, vector<3x64xf32>
    %4 = vector.shape_cast %1 : vector<1x16xf32> to vector<16xf32>
    %5 = vector.shape_cast %4 : vector<16xf32> to vector<1x1x16xf32>
    %6 = vector.broadcast %5 : vector<1x1x16xf32> to vector<2x16x16xf32>
    %7 = arith.mulf %0, %6 : vector<2x16x16xf32>
    %cst = arith.constant dense<0.000000e+00> : vector<2x16xf32>
    %8 = vector.multi_reduction <add>, %7, %cst [2] : vector<2x16x16xf32> to vector<2x16xf32>
    %9 = vector.extract_strided_slice %2 {offsets = [0, 0], sizes = [1, 16], strides = [1, 1]} : vector<3x16xf32> to vector<1x16xf32>
    %10 = vector.shape_cast %9 : vector<1x16xf32> to vector<16xf32>
    %11 = vector.shape_cast %10 : vector<16xf32> to vector<1x16xf32>
    %12 = vector.broadcast %11 : vector<1x16xf32> to vector<2x16xf32>
    %13 = arith.addf %8, %12 : vector<2x16xf32>
    %cst_8 = arith.constant 0.000000e+00 : f32
    %14 = vector.broadcast %cst_8 : f32 to vector<2x16xf32>
    %15 = arith.maximumf %13, %14 : vector<2x16xf32>
    %16 = vector.extract_strided_slice %2 {offsets = [1, 0], sizes = [1, 16], strides = [1, 1]} : vector<3x16xf32> to vector<1x16xf32>
    %17 = vector.shape_cast %16 : vector<1x16xf32> to vector<16xf32>
    %18 = vector.shape_cast %17 : vector<16xf32> to vector<1x16xf32>
    %19 = vector.broadcast %18 : vector<1x16xf32> to vector<2x16xf32>
    %20 = arith.mulf %15, %19 : vector<2x16xf32>
    %21 = vector.extract_strided_slice %2 {offsets = [2, 0], sizes = [1, 16], strides = [1, 1]} : vector<3x16xf32> to vector<1x16xf32>
    %22 = vector.shape_cast %21 : vector<1x16xf32> to vector<16xf32>
    %23 = vector.shape_cast %22 : vector<16xf32> to vector<1x16xf32>
    %24 = vector.broadcast %23 : vector<1x16xf32> to vector<2x16xf32>
    %25 = arith.addf %20, %24 : vector<2x16xf32>
    %cst_9 = arith.constant 0.000000e+00 : f32
    %26 = vector.broadcast %cst_9 : f32 to vector<2x16xf32>
    %27 = arith.maximumf %25, %26 : vector<2x16xf32>
    %c0_10 = arith.constant 0 : index
    %c0_11 = arith.constant 0 : index
    %28 = vector.load %arg4[%c0_10, %c0_11] : memref<16x64xf32, #tpu.memory_space<vmem>>, vector<16x64xf32>
    %cst_12 = arith.constant dense<0.000000e+00> : vector<2x64xf32>
    %29 = tpu.matmul %27, %28, %cst_12 {dimension_numbers = #tpu.dot_dimension_numbers<[1], [0], [0], [1], [0, 0, 1, 1], [], []>} : vector<2x16xf32>, vector<16x64xf32>, vector<2x64xf32> -> vector<2x64xf32>
    %30 = vector.extract_strided_slice %3 {offsets = [0, 0], sizes = [1, 64], strides = [1, 1]} : vector<3x64xf32> to vector<1x64xf32>
    %31 = vector.shape_cast %30 : vector<1x64xf32> to vector<64xf32>
    %32 = vector.shape_cast %31 : vector<64xf32> to vector<1x64xf32>
    %33 = vector.broadcast %32 : vector<1x64xf32> to vector<2x64xf32>
    %34 = arith.addf %29, %33 : vector<2x64xf32>
    %35 = vector.extract_strided_slice %3 {offsets = [1, 0], sizes = [1, 64], strides = [1, 1]} : vector<3x64xf32> to vector<1x64xf32>
    %36 = vector.shape_cast %35 : vector<1x64xf32> to vector<64xf32>
    %37 = vector.shape_cast %36 : vector<64xf32> to vector<1x64xf32>
    %38 = vector.broadcast %37 : vector<1x64xf32> to vector<2x64xf32>
    %39 = arith.mulf %34, %38 : vector<2x64xf32>
    %40 = vector.extract_strided_slice %3 {offsets = [2, 0], sizes = [1, 64], strides = [1, 1]} : vector<3x64xf32> to vector<1x64xf32>
    %41 = vector.shape_cast %40 : vector<1x64xf32> to vector<64xf32>
    %42 = vector.shape_cast %41 : vector<64xf32> to vector<1x64xf32>
    %43 = vector.broadcast %42 : vector<1x64xf32> to vector<2x64xf32>
    %44 = arith.addf %39, %43 : vector<2x64xf32>
    %cst_13 = arith.constant 0.000000e+00 : f32
    %45 = vector.broadcast %cst_13 : f32 to vector<2x64xf32>
    %46 = arith.maximumf %44, %45 : vector<2x64xf32>
    %c0_14 = arith.constant 0 : index
    %c0_15 = arith.constant 0 : index
    %47 = vector.load %arg6[%c0_14, %c0_15] : memref<64x128xf32, #tpu.memory_space<vmem>>, vector<64x128xf32>
    %cst_16 = arith.constant dense<0.000000e+00> : vector<2x128xf32>
    %48 = tpu.matmul %46, %47, %cst_16 {dimension_numbers = #tpu.dot_dimension_numbers<[1], [0], [0], [1], [0, 0, 1, 1], [], []>} : vector<2x64xf32>, vector<64x128xf32>, vector<2x128xf32> -> vector<2x128xf32>
    %c0_17 = arith.constant 0 : index
    %c0_18 = arith.constant 0 : index
    %49 = vector.load %arg7[%c0_17, %c0_18] : memref<1x128xf32, #tpu.memory_space<vmem>>, vector<1x128xf32>
    %50 = vector.broadcast %49 : vector<1x128xf32> to vector<2x128xf32>
    %51 = arith.addf %48, %50 : vector<2x128xf32>
    %cst_19 = arith.constant dense<0xFF800000> : vector<2xf32>
    %52 = vector.multi_reduction <maximumf>, %51, %cst_19 [1] : vector<2x128xf32> to vector<2xf32>
    %53 = vector.shape_cast %52 : vector<2xf32> to vector<2x1xf32>
    %54 = vector.broadcast %53 : vector<2x1xf32> to vector<2x128xf32>
    %55 = arith.subf %51, %54 : vector<2x128xf32>
    %56 = math.exp %55 : vector<2x128xf32>
    %cst_20 = arith.constant dense<0.000000e+00> : vector<2xf32>
    %57 = vector.multi_reduction <add>, %56, %cst_20 [1] : vector<2x128xf32> to vector<2xf32>
    %58 = vector.shape_cast %57 : vector<2xf32> to vector<2x1xf32>
    %59 = tpu.reciprocal %58 {approx = true} : vector<2x1xf32> -> vector<2x1xf32>
    %60 = vector.broadcast %59 : vector<2x1xf32> to vector<2x128xf32>
    %61 = arith.mulf %56, %60 : vector<2x128xf32>
    %c0_21 = arith.constant 0 : index
    %c0_22 = arith.constant 0 : index
    %62 = vector.load %arg8[%c0_21, %c0_22] : memref<2x128xf32, #tpu.memory_space<vmem>>, vector<2x128xf32>
    tpu.vector_store %arg8[%c0_21, %c0_22], %61 {strides = array<i32>} : memref<2x128xf32, #tpu.memory_space<vmem>>, vector<2x128xf32>,
    return
  }
  func.func @transform_0(%arg0: i32) -> (i32, i32, i32) {
    %c0_i32 = arith.constant 0 : i32
    %c0_i32_0 = arith.constant 0 : i32
    %c0_i32_1 = arith.constant 0 : i32
    return %arg0, %c0_i32, %c0_i32_0 : i32, i32, i32
  }
  func.func @transform_1(%arg0: i32) -> (i32, i32) {
    %c0_i32 = arith.constant 0 : i32
    %c0_i32_0 = arith.constant 0 : i32
    %c0_i32_1 = arith.constant 0 : i32
    return %c0_i32, %c0_i32_0 : i32, i32
  }
  func.func @transform_2(%arg0: i32) -> (i32, i32) {
    %c0_i32 = arith.constant 0 : i32
    %c0_i32_0 = arith.constant 0 : i32
    %c0_i32_1 = arith.constant 0 : i32
    return %c0_i32, %c0_i32_0 : i32, i32
  }
  func.func @transform_3(%arg0: i32) -> (i32, i32) {
    %c0_i32 = arith.constant 0 : i32
    %c0_i32_0 = arith.constant 0 : i32
    %c0_i32_1 = arith.constant 0 : i32
    return %c0_i32, %c0_i32_0 : i32, i32
  }
  func.func @transform_4(%arg0: i32) -> (i32, i32) {
    %c0_i32 = arith.constant 0 : i32
    %c0_i32_0 = arith.constant 0 : i32
    %c0_i32_1 = arith.constant 0 : i32
    return %c0_i32, %c0_i32_0 : i32, i32
  }
  func.func @transform_5(%arg0: i32) -> (i32, i32) {
    %c0_i32 = arith.constant 0 : i32
    %c0_i32_0 = arith.constant 0 : i32
    %c0_i32_1 = arith.constant 0 : i32
    return %c0_i32, %c0_i32_0 : i32, i32
  }
  func.func @transform_6(%arg0: i32) -> (i32, i32) {
    %c0_i32 = arith.constant 0 : i32
    %c0_i32_0 = arith.constant 0 : i32
    %c0_i32_1 = arith.constant 0 : i32
    return %c0_i32, %c0_i32_0 : i32, i32
  }
  func.func @transform_7(%arg0: i32) -> (i32, i32) {
    %c0_i32 = arith.constant 0 : i32
    %c0_i32_0 = arith.constant 0 : i32
    return %arg0, %c0_i32 : i32, i32
  }
}

</mosaic_0001>

<bundles_post_ra>
// kernel: gcn_base_forward.1
= control target key start
LH: loop header
LB: loop body
LE: loop exit
PB: predicated region body
PF: predicated region fallthrough
CT: control target
= control target key end

     0   :  { %vm44_vm0 = vcmask 130048   ;;  %s593_s0 = inlined_call_operand.vmem [shape: f32[2,16,16], index: 0, kind: input, shape index: {}]   ;;  %s594_s1 = inlined_call_operand.vmem [shape: f32[1,16], index: 1, kind: input, shape index: {}]   ;;  %s595_s2 = inlined_call_operand.vmem [shape: f32[3,16], index: 2, kind: input, shape index: {}]   ;;  %s596_s3 = inlined_call_operand.vmem [shape: f32[16,64], index: 3, kind: input, shape index: {}]   ;;  %s597_s4 = inlined_call_operand.vmem [shape: f32[3,64], index: 4, kind: input, shape index: {}]   ;;  %s598_s5 = inlined_call_operand.vmem [shape: f32[64,128], index: 5, kind: input, shape index: {}]   ;;  %s599_s6 = inlined_call_operand.vmem [shape: f32[1,128], index: 6, kind: input, shape index: {}]   ;;  %s600_s7 = inlined_call_operand.hbm [shape: f32[2,128], index: 7, kind: output, shape index: {}]  }
   0x1   :  { %v29_v0 = vld [vmem:[%s593_s0 + $0x10] sm:$0xff]  ;;  %v364_v1 = vld [vmem:[%s594_s1] ss:$0 sm:$0xff]  ;;  %v30_v5 = vld [vmem:[%s593_s0 + $0x18] sm:$0xff] }
   0x2   :  { %v27_v2 = vld [vmem:[%s593_s0] sm:$0xff]  ;;  %v42_v3 = vmul.f32 %v364_v1, %v29_v0  ;;  %v28_v6 = vld [vmem:[%s593_s0 + $0x8] sm:$0xff]  ;;  %v43_v7 = vmul.f32 %v364_v1, %v30_v5 }
   0x3   :  { %v40_v4 = vmul.f32 %v364_v1, %v27_v2  ;;  %v41_v8 = vmul.f32 %v364_v1, %v28_v6 }
   0x4   :  { %12 = vsyncpa [#allocation3], 0  ;;  %v51_v9 = vsel %vm44_vm0, %v42_v3, 0.0  ;;  %v54_v11 = vsel %vm44_vm0, %v43_v7, 0.0  ;;  %v57_v13 = vlaneseq  ;;  %v32_v16 = vld [vmem:[%s595_s2] sm:$0x7] }
   0x5   :  { %v45_v10 = vsel %vm44_vm0, %v40_v4, 0.0  ;;  %52 = vadd.xlane.f32.xlu1 %v51_v9  ;;  %v48_v12 = vsel %vm44_vm0, %v41_v8, 0.0  ;;  %v456_v22 = vmov 0   ;;  %v119_v53 = vld [vmem:[%s596_s3] sm:$0xff]  ;;  %v120_v54 = vld [vmem:[%s596_s3 + $0x8] sm:$0xff]  ;;  %v457_v56 = vmov 0.0|0.0  }
   0x6   :  { %46 = vadd.xlane.f32.xlu0 %v45_v10  ;;  %v521_v14 = vshrl.u32 %v57_v13, 7  ;;  %427 = vset.pattern.permute.xlu1 %v456_v22  ;;  %v407_v55 = vpack.c.bf16 %v120_v54, %v119_v53  ;;  %vm458_vm1 = vmmov 0   ;;  %v459_v57 = vmov 0.0   ;;  %v248_v58 = vld [vmem:[%s598_s5] sm:$0xff]  ;;  %v249_v59 = vld [vmem:[%s598_s5 + $0x8] sm:$0xff]  ;;  %v250_v60 = vld [vmem:[%s598_s5 + $0x10] sm:$0xff] }
   0x7   :  { %426 = vset.pattern.permute.xlu0 %v456_v22  ;;  %406 = vmatprep.subr.bf16.mxu0 %v457_v56  ;;  %v410_v61 = vpack.c.bf16 %v249_v59, %v248_v58  ;;  %v251_v62 = vld [vmem:[%s598_s5 + $0x18] sm:$0xff]  ;;  %v142_v0 = vand.u32 127, %v57_v13  ;;  %vm152_vm2 = vcmask 130112   ;;  %vm163_vm3 = vcmask 1041409   ;;  %v252_v13 = vld [vmem:[%s598_s5 + $0x20] sm:$0xff]  ;;  %v254_v22 = vld [vmem:[%s598_s5 + $0x30] sm:$0xff] }
   0x8   :  { %v59_v15 = vsub.s32 0, %v521_v14  ;;  %v81_v18 = vsub.s32 1, %v521_v14  ;;  %v99_v20 = vsub.s32 2, %v521_v14  ;;  %408 = vmatpush3.bf16.msra.mxu0 %v407_v55  ;;  %409 = vmatprep.subr.bf16.mxu1 %v457_v56  ;;  %v413_v63 = vpack.c.bf16 %v251_v62, %v250_v60 }
   0x9   :  { %55 = vadd.xlane.f32.xlu1 %v54_v11  ;;  %384 = vmatprep.mubr.msk.f32.mxu0 %vm458_vm1, %v459_v57  ;;  %v147_v1 = vadd.s32 4294967288, %v142_v0  ;;  %v145_v5 = vsub.s32 %v142_v0, %v521_v14  ;;  %vm263_vm4 = vcmask 523264   ;;  %vm337_vm5 = vcmask 1041408  }
   0xa   :  { %49 = vadd.xlane.f32.xlu0 %v48_v12  ;;  %v60_v17 = vrot.slane %v32_v16, %v59_v15  ;;  %v82_v19 = vrot.slane %v32_v16, %v81_v18  ;;  %v100_v21 = vrot.slane %v32_v16, %v99_v20  ;;  %403 = vmatprep.mubr.msk.f32.mxu1 %vm458_vm1, %v459_v57 }
   0xb   :  { %411 = vmatpush3.bf16.msra.mxu1 %v410_v61  ;;  %v150_v3 = vsub.s32 %v147_v1, %v521_v14 }
   0xc   :  { %412 = vmatprep.subr.bf16.mxu1 %v457_v56 }
   0xf   :  { %414 = vmatpush3.bf16.msra.mxu1 %v413_v63 }
  0x10   :  { %415 = vmatprep.subr.bf16.mxu1 %v457_v56 }
  0x1a   :  { %67 = vbcast.lane.b32.xlu1 %v60_v17, 264 }
  0x1e   :  { %85 = vbcast.lane.b32.xlu1 %v82_v19, 256 }
  0x20   :  { %63 = vbcast.lane.b32.xlu0 %v60_v17, 256 }
  0x22   :  { %89 = vbcast.lane.b32.xlu1 %v82_v19, 264  ;;  %v253_v19 = vld [vmem:[%s598_s5 + $0x28] sm:$0xff] }
  0x24   :  { %103 = vbcast.lane.b32.xlu0 %v100_v21, 256 }
  0x26   :  { %107 = vbcast.lane.b32.xlu1 %v100_v21, 264  ;;  %v416_v21 = vpack.c.bf16 %v253_v19, %v252_v13 }
  0x28   :  { %417 = vmatpush3.bf16.msra.mxu1 %v416_v21 }
  0x29   :  { %418 = vmatprep.subr.bf16.mxu1 %v457_v56 }
  0x92   :  { %v53_v23 = vpop.xlane.xlu1 %52 }
  0x93   :  { %v47_v24 = vpop.xlane.xlu0 %46 }
  0x96   :  { %v56_v25 = vpop.xlane.xlu1 %55 }
  0x97   :  { %v50_v26 = vpop.xlane.xlu0 %49 }
  0x9a   :  { %v68_v27 = vpop.permute.xlu1 %67 }
  0x9b   :  { %v64_v28 = vpop.permute.xlu0 %63  ;;  %v72_v34 = vadd.f32 %v68_v27, %v50_v26  ;;  %v74_v35 = vadd.f32 %v68_v27, %v56_v25  ;;  %v33_v25 = vld [vmem:[%s597_s4] sm:$0x7]  ;;  %s460_s4 = smov [#allocation2]  }
  0x9c   :  { %v71_v29 = vadd.f32 %v64_v28, %v47_v24  ;;  %v73_v30 = vadd.f32 %v64_v28, %v53_v23  ;;  %v255_v23 = vld [vmem:[%s598_s5 + $0x38] sm:$0xff]  ;;  %v124_v26 = vrot.slane %v33_v25, %v59_v15  ;;  %v240_v27 = vrot.slane %v33_v25, %v81_v18  ;;  %s356_s9 = sshll.u32 %s460_s4, 4  ;;  %s357_s9 = int_to_ptr.vmem [resolvable:$true] %s356_s9 }
  0x9d   :  { %v76_v40 = vmax.f32 %v72_v34, 0.0  ;;  %v78_v41 = vmax.f32 %v74_v35, 0.0  ;;  %v419_v24 = vpack.c.bf16 %v255_v23, %v254_v22  ;;  %v366_v35 = vld [vmem:[%s599_s6] ss:$0 sm:$0xff]  ;;  %s432_s6 = scalar_lea.vmem %s357_s9, 32  ;;  %p437_p1 = scmp.lt.s32.totalorder %s357_s9, %s357_s9 }
  0x9e   :  { %v75_v31 = vmax.f32 %v71_v29, 0.0  ;;  %v86_v32 = vpop.permute.xlu1 %85  ;;  %v77_v37 = vmax.f32 %v73_v30, 0.0  ;;  %v245_v30 = vrot.slane %v33_v25, %v99_v20  ;;  %p433_p0 = scmp.ne.s32.totalorder %s357_s9, %s432_s6  ;;  %p438_p2 = scmp.lt.s32.totalorder %s432_s6, %s432_s6 }
  0x9f   :  { %v104_v33 = vpop.permute.xlu0 %103  ;;  %420 = vmatpush3.bf16.msra.mxu1 %v419_v24 }
  0xa0   :  { %v93_v36 = vmul.f32 %v86_v32, %v75_v31  ;;  %v95_v43 = vmul.f32 %v86_v32, %v77_v37  ;;  %p439_p3 = por %p438_p2, %p437_p1 }
  0xa2   :  { %v111_v38 = vadd.f32 %v104_v33, %v93_v36  ;;  %v90_v39 = vpop.permute.xlu1 %89  ;;  %v113_v49 = vadd.f32 %v104_v33, %v95_v43  ;;  %p440_p4 = pnand %p439_p3, %p433_p0 }
  0xa3   :  { %v94_v44 = vmul.f32 %v90_v39, %v76_v40  ;;  %v96_v45 = vmul.f32 %v90_v39, %v78_v41 }
  0xa4   :  { %v115_v42 = vmax.f32 %v111_v38, 0.0  ;;  %v117_v52 = vmax.f32 %v113_v49, 0.0 }
  0xa6   :  { %130 = vperm.xlu0 %426, %v115_v42   ;;  %v108_v46 = vpop.permute.xlu1 %107 }
  0xa7   :  { %v112_v47 = vadd.f32 %v108_v46, %v94_v44  ;;  %v114_v48 = vadd.f32 %v108_v46, %v96_v45 }
  0xa9   :  { %v116_v50 = vmax.f32 %v112_v47, 0.0  ;;  %v118_v51 = vmax.f32 %v114_v48, 0.0 }
  0xab   :  { %133 = vperm.xlu1 %427, %v116_v50   ;;  %139 = vperm.xlu0 %426, %v118_v51  }
  0xaf   :  { %136 = vperm.xlu1 %427, %v117_v52  }
 0x125   :  { %v131_v2 = vpop.permute.xlu0 %130 }
 0x126   :  { %v146_v9 = vrot.slane %v131_v2, %v145_v5 }
 0x12a   :  { %v134_v4 = vpop.permute.xlu1 %133  ;;  %v140_v6 = vpop.permute.xlu0 %139 }
 0x12b   :  { %v151_v7 = vrot.slane %v134_v4, %v150_v3  ;;  %v161_v10 = vrot.slane %v140_v6, %v150_v3 }
 0x12d   :  { %v153_v12 = vsel %vm152_vm2, %v151_v7, %v146_v9 }
 0x12e   :  { %v137_v8 = vpop.permute.xlu1 %136 }
 0x12f   :  { %v157_v11 = vrot.slane %v137_v8, %v145_v5 }
 0x131   :  { %v162_v16 = vsel %vm152_vm2, %v161_v10, %v157_v11 }
 0x132   :  { %v164_v17 = vsel %vm163_vm3, %v162_v16, %v153_v12 }
 0x133   :  { %385 = vmatmul.mubr.msk.f32.vlgmr.msra.gmra.mrb[0].mxu0 %vm44_vm0, %v164_v17 }
 0x206   :  { %v233_v28 = vpop.f32.mrb[0].mxu0 }
 0x207   :  { %v234_v29 = vadd.f32 %v233_v28, %v124_v26  ;;  %v386_v31 = vpop.f32.mrb[1].mxu0 }
 0x209   :  { %v241_v32 = vmul.f32 %v240_v27, %v234_v29 }
 0x20b   :  { %v246_v33 = vadd.f32 %v245_v30, %v241_v32 }
 0x20d   :  { %v247_v34 = vmax.f32 %v246_v33, 0.0 }
 0x20f   :  { %404 = vmatmul.mubr.msk.f32.vlgmr.msra.gmra.mrb[0].mxu1 %vm263_vm4, %v247_v34 }
 0x2e2   :  { %v333_v36 = vpop.f32.mrb[0].mxu1 }
 0x2e3   :  { %v334_v15 = vadd.f32 %v366_v35, %v333_v36  ;;  %v405_v37 = vpop.f32.mrb[1].mxu1 }
 0x2e5   :  { %v338_v18 = vsel %vm337_vm5, %v334_v15, -inf }
 0x2e6   :  { %339 = vmax.xlane.f32.xlu1 %v338_v18 }
 0x373   :  { %v340_v38 = vpop.xlane.xlu1 %339 }
 0x374   :  { %v341_v39 = vsub.f32 %v334_v15, %v340_v38 }
 0x376   :  { %v342_v14 = vmul.f32 1.442695, %v341_v39 }
 0x378   :  { %428 = vpow2.f32 %v342_v14 }
 0x382   :  { %v429_v20 = vpop.eup %428 }
 0x383   :  { %v344_v40 = vsel %vm337_vm5, %v429_v20, 0.0 }
 0x384   :  { %345 = vadd.xlane.f32.xlu0 %v344_v40 }
 0x411   :  { %v346_v41 = vpop.xlane.xlu0 %345 }
 0x412   :  { %430 = vrcp.f32 %v346_v41 }
 0x41c   :  { %v431_v42 = vpop.eup %430 }
 0x41d   :  { %v348_v43 = vmul.f32 %v431_v42, %v429_v20 }
 0x41f   :  { %349 = vst [vmem:[#allocation2] sm:$0x3] %v348_v43 }
 0x420   :  { %443 = shalt.err (!%p440_p4)
}
 0x421   :  { %s444_s1 = scalar_lea.hbm %s600_s7, 32 }
 0x422   :  { %p445_p5 = scmp.ne.s32.totalorder %s600_s7, %s444_s1  ;;  %p448_p6 = scmp.lt.u32.totalorder %s444_s1, %s600_s7 }
 0x424   :  { %p450_p7 = pnand %p448_p6, %p445_p5 }
 0x426   :  { %453 = shalt.err (!%p450_p7)
}
 0x427   :  { %359 = dma.vmem_to_hbm [thread:$0]  %s357_s9, 32, %s600_s7, [#allocation3]  }
 0x428   :  { %454 = dma.done.wait [#allocation3], 32  }
 0x429   :  { %455 = vsyncadd [#allocation3], 4294967264 }
 0x42a   :  { %363 = vsyncpa [#allocation3], 1 }

</bundles_post_ra>
